<compile_context>
chip_gen: v6e
topology: v6e:2x2x1
jax: 0.10.0
libtpu: 0.0.40
codegen_flags: <defaults>
</compile_context>

<pallas_src>
import functools
import math

import jax
import jax.numpy as jnp
from jax.experimental import pallas as pl
from jax.experimental.pallas import tpu as pltpu


def _linear_kernel(x_ref, w_ref, b_ref, o_ref):
    # x_ref: [tm, K] f32   w_ref: [K, n_pad] bf16   b_ref: [1, n_pad] f32
    # o_ref: [tm, n_pad] f32
    x_bf16 = x_ref[...].astype(jnp.bfloat16)          # in-kernel cast (VPU slack)
    acc = jnp.dot(x_bf16, w_ref[...], preferred_element_type=jnp.float32)
    o_ref[...] = acc + b_ref[...]


def _round_up(x, m):
    return ((x + m - 1) // m) * m


def _choose_tile(batch, tm_max):
    """Pick (tm_eff, b_pad): >=2 tiles when possible (v7x megacore), bounded pad waste."""
    b16 = max(16, _round_up(batch, 16))                # bf16 packs 16 rows / vreg
    min_tiles = 2 if b16 >= 32 else 1                  # keep both v7x TCs busy
    tm_eff = min(tm_max, _round_up(-(-b16 // min_tiles), 16))
    while tm_eff > 16:
        b_pad = _round_up(b16, tm_eff)
        if (b_pad - b16) * 8 <= b16:                   # padding waste <= 12.5%
            break
        tm_eff = _round_up(tm_eff // 2, 16)
    b_pad = _round_up(b16, tm_eff)
    return tm_eff, b_pad


def prepare_fc_params(w, b):
    """One-time preprocessing of nn.Linear params (hoisted out of the hot path).

    w: [num_class, 512] f32, b: [num_class] f32
    -> w_t: [512, n_pad] bf16 (transposed, zero-padded), b_p: [1, n_pad] f32
    """
    num_class, k = w.shape
    n_pad = max(128, _round_up(num_class, 128))        # lane-dense; do NOT widen further
    w_t = jnp.zeros((k, n_pad), jnp.bfloat16).at[:, :num_class].set(
        w.T.astype(jnp.bfloat16))
    b_p = jnp.zeros((1, n_pad), jnp.float32).at[0, :num_class].set(
        b.astype(jnp.float32))
    return w_t, b_p


@functools.partial(jax.jit, static_argnames=("num_class", "tm"))
def net_forward(x_nchw, w_t, b_p, *, num_class, tm=2048):
    """Classifier head of Net.forward (flatten + fc).

    x_nchw: [B, 512, 1, 1] backbone features (f32; cast to bf16 inside the kernel).
    w_t:    [512, n_pad] bf16 pre-transposed/padded weight from prepare_fc_params.
    b_p:    [1, n_pad]  f32 padded bias from prepare_fc_params.
    Returns [B, num_class] f32.
    """
    B = x_nchw.shape[0]
    K, n_pad = w_t.shape

    # torch.flatten(x, start_dim=1) -> [B, K]; under jit this is a free relayout.
    feature = x_nchw.reshape(B, -1)
    assert feature.shape[1] == K

    tm_eff, b_pad = _choose_tile(B, tm)
    if b_pad != B:
        feature = jnp.pad(feature, ((0, b_pad - B), (0, 0)))
    nb = b_pad // tm_eff

    out_padded = pl.pallas_call(
        _linear_kernel,
        out_shape=jax.ShapeDtypeStruct((b_pad, n_pad), jnp.float32),
        grid=(nb,),
        in_specs=[
            pl.BlockSpec((tm_eff, K), lambda i: (i, 0)),      # x tile, streamed
            pl.BlockSpec((K, n_pad), lambda i: (0, 0)),       # weight, VMEM-resident
            pl.BlockSpec((1, n_pad), lambda i: (0, 0)),       # bias, VMEM-resident
        ],
        out_specs=pl.BlockSpec((tm_eff, n_pad), lambda i: (i, 0)),
        compiler_params=pltpu.CompilerParams(
            dimension_semantics=("parallel",),                # shard B tiles on v7x
        ),
    )(feature, w_t, b_p)

    return out_padded[:B, :num_class]


def init_params(key, num_class, in_features=512):
    # Deterministic init matching nn.Linear's default: U(-1/sqrt(fan_in), 1/sqrt(fan_in))
    kw, kb = jax.random.split(key)
    bound = 1.0 / math.sqrt(in_features)
    w = jax.random.uniform(kw, (num_class, in_features), jnp.float32, -bound, bound)
    b = jax.random.uniform(kb, (num_class,), jnp.float32, -bound, bound)
    return w, b


if __name__ == "__main__":
    key = jax.random.PRNGKey(0)
    k_x, k_p = jax.random.split(key)

    B, C, H, W = 2, 512, 1, 1          # backbone output feature map (NCHW)
    num_class = 10

    x = jax.random.normal(k_x, (B, C, H, W), jnp.float32)
    w, b = init_params(k_p, num_class, in_features=512)

    # One-time param preprocessing (hoisted out of the forward path).
    w_t, b_p = prepare_fc_params(w, b)

    out = net_forward(x, w_t, b_p, num_class=num_class)
    out = jax.block_until_ready(out)
    assert out.shape == (B, num_class)

    # Reference with the same bf16 operand precision, f32 accumulation.
    feat = x.reshape(B, -1)
    ref = jnp.dot(feat.astype(jnp.bfloat16),
                  w.T.astype(jnp.bfloat16),
                  preferred_element_type=jnp.float32) + b.astype(jnp.float32)
    assert jnp.allclose(out, ref, atol=1e-2, rtol=1e-2), (
        float(jnp.max(jnp.abs(out - ref))))

    # Sanity check vs the full-f32 math (looser tolerance for the bf16 operands).
    ref_f32 = feat @ w.T + b
    assert jnp.allclose(out, ref_f32, atol=5e-2, rtol=5e-2)

    print("KERNEL_OK")
</pallas_src>

<mosaic_0001>
module attributes {stable_mosaic.version = 11 : i64} {
  func.func @_linear_kernel(%arg0: i32, %arg1: memref<16x512xf32, #tpu.memory_space<vmem>>, %arg2: memref<512x128xbf16, #tpu.memory_space<vmem>>, %arg3: memref<1x128xf32, #tpu.memory_space<vmem>>, %arg4: memref<16x128xf32, #tpu.memory_space<vmem>>) attributes {dimension_semantics = [#tpu.dimension_semantics<parallel>], iteration_bounds = array<i64: 1>, scalar_prefetch = 0 : i64, scratch_operands = 0 : i64, tpu.core_type = #tpu.core_type<tc>, window_params = [{transform_indices = @transform_0, window_bounds = array<i64: 16, 512>}, {pipeline_mode = #tpu.pipeline_mode<synchronous>, transform_indices = @transform_1, window_bounds = array<i64: 512, 128>}, {pipeline_mode = #tpu.pipeline_mode<synchronous>, transform_indices = @transform_2, window_bounds = array<i64: 1, 128>}, {transform_indices = @transform_3, window_bounds = array<i64: 16, 128>}]} {
    %c0 = arith.constant 0 : index
    %c0_0 = arith.constant 0 : index
    %0 = vector.load %arg1[%c0, %c0_0] : memref<16x512xf32, #tpu.memory_space<vmem>>, vector<16x512xf32>
    %1 = arith.truncf %0 : vector<16x512xf32> to vector<16x512xbf16>
    %c0_1 = arith.constant 0 : index
    %c0_2 = arith.constant 0 : index
    %2 = vector.load %arg2[%c0_1, %c0_2] : memref<512x128xbf16, #tpu.memory_space<vmem>>, vector<512x128xbf16>
    %cst = arith.constant dense<0.000000e+00> : vector<16x128xf32>
    %3 = tpu.matmul %1, %2, %cst {dimension_numbers = #tpu.dot_dimension_numbers<[1], [0], [0], [1], [0, 0, 1, 1], [], []>} : vector<16x512xbf16>, vector<512x128xbf16>, vector<16x128xf32> -> vector<16x128xf32>
    %c0_3 = arith.constant 0 : index
    %c0_4 = arith.constant 0 : index
    %4 = vector.load %arg3[%c0_3, %c0_4] : memref<1x128xf32, #tpu.memory_space<vmem>>, vector<1x128xf32>
    %5 = vector.broadcast %4 : vector<1x128xf32> to vector<16x128xf32>
    %6 = arith.addf %3, %5 : vector<16x128xf32>
    %c0_5 = arith.constant 0 : index
    %c0_6 = arith.constant 0 : index
    %7 = vector.load %arg4[%c0_5, %c0_6] : memref<16x128xf32, #tpu.memory_space<vmem>>, vector<16x128xf32>
    tpu.vector_store %arg4[%c0_5, %c0_6], %6 {strides = array<i32>} : memref<16x128xf32, #tpu.memory_space<vmem>>, vector<16x128xf32>,
    return
  }
  func.func @transform_0(%arg0: i32) -> (i32, i32) {
    %c0_i32 = arith.constant 0 : i32
    %c0_i32_0 = arith.constant 0 : i32
    return %arg0, %c0_i32 : i32, i32
  }
  func.func @transform_1(%arg0: i32) -> (i32, i32) {
    %c0_i32 = arith.constant 0 : i32
    %c0_i32_0 = arith.constant 0 : i32
    %c0_i32_1 = arith.constant 0 : i32
    return %c0_i32, %c0_i32_0 : i32, i32
  }
  func.func @transform_2(%arg0: i32) -> (i32, i32) {
    %c0_i32 = arith.constant 0 : i32
    %c0_i32_0 = arith.constant 0 : i32
    %c0_i32_1 = arith.constant 0 : i32
    return %c0_i32, %c0_i32_0 : i32, i32
  }
  func.func @transform_3(%arg0: i32) -> (i32, i32) {
    %c0_i32 = arith.constant 0 : i32
    %c0_i32_0 = arith.constant 0 : i32
    return %arg0, %c0_i32 : i32, i32
  }
}

</mosaic_0001>

<bundles_post_ra>
// kernel: net_forward.1
= control target key start
LH: loop header
LB: loop body
LE: loop exit
PB: predicated region body
PF: predicated region fallthrough
CT: control target
= control target key end

     0   :  { %8 = vsyncpa [#allocation3], 0  ;;  %s527_s12 = smov [#allocation2]   ;;  %s586_s0 = inlined_call_operand.vmem [shape: f32[16,512], index: 0, kind: input, shape index: {}]   ;;  %s587_s1 = inlined_call_operand.hbm [shape: bf16[512,128], index: 1, kind: input, shape index: {}]   ;;  %s588_s2 = inlined_call_operand.vmem [shape: f32[1,128], index: 2, kind: input, shape index: {}]   ;;  %s589_s3 = inlined_call_operand.vmem [shape: f32[16,128], index: 3, kind: output, shape index: {}]  }
   0x1   :  { %s16_s13 = sshll.u32 %s527_s12, 4  ;;  %s17_s13 = int_to_ptr.vmem [resolvable:$true] %s16_s13 }
   0x2   :  { %s513_s14 = scalar_lea.vmem %s17_s13, 4096  ;;  %p518_p1 = scmp.lt.s32.totalorder %s17_s13, %s17_s13 }
   0x3   :  { %p514_p0 = scmp.ne.s32.totalorder %s17_s13, %s513_s14  ;;  %p519_p2 = scmp.lt.s32.totalorder %s513_s14, %s513_s14 }
   0x5   :  { %p520_p3 = por %p519_p2, %p518_p1 }
   0x7   :  { %p521_p4 = pnand %p520_p3, %p514_p0 }
   0x9   :  { %524 = shalt.err (!%p521_p4)
}
   0xa   :  { %s528_s15 = smov 64   ;;  %s529_s16 = smov 4  }
   0xb   :  { %22 = dma.hbm_to_vmem [thread:$0]  %s587_s1, 4096, %s17_s13, [#allocation3], %s528_s15, %s528_s15, %s529_s16  }
   0xc   :  { %525 = dma.done.wait [#allocation3], 4096  }
   0xd   :  { %526 = vsyncadd [#allocation3], 4294963200  ;;  %v473_v0 = vld [vmem:[#allocation2 + $0x78] sm:$0xff]   ;;  %v477_v4 = vld [vmem:[#allocation2 + $0x70] sm:$0xff]  }
   0xe   :  { %v474_v1 = vld [vmem:[#allocation2 + $0xf8] sm:$0xff]   ;;  %426 = vmatprep.subr.bf16.mxu0 %v473_v0  ;;  %v478_v5 = vld [vmem:[#allocation2 + $0xf0] sm:$0xff]   ;;  %v481_v8 = vld [vmem:[#allocation2 + $0x68] sm:$0xff]  }
   0xf   :  { %v475_v2 = vld [vmem:[#allocation2 + $0x38] sm:$0xff]   ;;  %448 = vmatprep.subr.bf16.mxu1 %v474_v1  ;;  %v479_v6 = vld [vmem:[#allocation2 + $0x30] sm:$0xff]   ;;  %v482_v9 = vld [vmem:[#allocation2 + $0xe8] sm:$0xff]  }
  0x10   :  { %v476_v3 = vld [vmem:[#allocation2 + $0xb8] sm:$0xff]   ;;  %427 = vmatpush3.bf16.msra.mxu0 %v475_v2  ;;  %v480_v7 = vld [vmem:[#allocation2 + $0xb0] sm:$0xff]   ;;  %v483_v10 = vld [vmem:[#allocation2 + $0x28] sm:$0xff]  }
  0x11   :  { %449 = vmatpush3.bf16.msra.mxu1 %v476_v3  ;;  %428 = vmatprep.subr.bf16.mxu0 %v477_v4  ;;  %v484_v11 = vld [vmem:[#allocation2 + $0xa8] sm:$0xff]   ;;  %v485_v12 = vld [vmem:[#allocation2 + $0x60] sm:$0xff]   ;;  %v489_v16 = vld [vmem:[#allocation2 + $0x58] sm:$0xff]  }
  0x12   :  { %450 = vmatprep.subr.bf16.mxu1 %v478_v5  ;;  %v486_v13 = vld [vmem:[#allocation2 + $0xe0] sm:$0xff]   ;;  %v490_v17 = vld [vmem:[#allocation2 + $0xd8] sm:$0xff]   ;;  %v493_v20 = vld [vmem:[#allocation2 + $0x50] sm:$0xff]  }
  0x13   :  { %v487_v14 = vld [vmem:[#allocation2 + $0x20] sm:$0xff]   ;;  %v491_v18 = vld [vmem:[#allocation2 + $0x18] sm:$0xff]   ;;  %v494_v21 = vld [vmem:[#allocation2 + $0xd0] sm:$0xff]  }
  0x14   :  { %429 = vmatpush3.bf16.msra.mxu0 %v479_v6  ;;  %v488_v15 = vld [vmem:[#allocation2 + $0xa0] sm:$0xff]   ;;  %v492_v19 = vld [vmem:[#allocation2 + $0x98] sm:$0xff]   ;;  %v495_v22 = vld [vmem:[#allocation2 + $0x10] sm:$0xff]  }
  0x15   :  { %451 = vmatpush3.bf16.msra.mxu1 %v480_v7  ;;  %430 = vmatprep.subr.bf16.mxu0 %v481_v8  ;;  %v496_v23 = vld [vmem:[#allocation2 + $0x90] sm:$0xff]   ;;  %v497_v24 = vld [vmem:[#allocation2 + $0x48] sm:$0xff]   ;;  %v501_v28 = vld [vmem:[#allocation2 + $0x40] sm:$0xff]  }
  0x16   :  { %452 = vmatprep.subr.bf16.mxu1 %v482_v9  ;;  %v498_v25 = vld [vmem:[#allocation2 + $0xc8] sm:$0xff]   ;;  %v502_v29 = vld [vmem:[#allocation2 + $0xc0] sm:$0xff]   ;;  %v32_v34 = vld [vmem:[%s586_s0 + $0x18] sm:$0xff] }
  0x17   :  { %v499_v26 = vld [vmem:[#allocation2 + $0x8] sm:$0xff]   ;;  %v503_v30 = vld [vmem:[#allocation2] sm:$0xff]   ;;  %v36_v36 = vld [vmem:[%s586_s0 + $0x38] sm:$0xff] }
  0x18   :  { %431 = vmatpush3.bf16.msra.mxu0 %v483_v10  ;;  %v500_v27 = vld [vmem:[#allocation2 + $0x88] sm:$0xff]   ;;  %v504_v31 = vld [vmem:[#allocation2 + $0x80] sm:$0xff]   ;;  %v40_v39 = vpack.c.bf16 %v36_v36, %v32_v34  ;;  %v31_v41 = vld [vmem:[%s586_s0 + $0x10] sm:$0xff] }
  0x19   :  { %453 = vmatpush3.bf16.msra.mxu1 %v484_v11  ;;  %432 = vmatprep.subr.bf16.mxu0 %v485_v12  ;;  %v30_v32 = vld [vmem:[%s586_s0 + $0x8] sm:$0xff]  ;;  %v29_v37 = vld [vmem:[%s586_s0] sm:$0xff]  ;;  %v35_v42 = vld [vmem:[%s586_s0 + $0x30] sm:$0xff] }
  0x1a   :  { %454 = vmatprep.subr.bf16.mxu1 %v486_v13  ;;  %v34_v33 = vld [vmem:[%s586_s0 + $0x28] sm:$0xff]  ;;  %v33_v38 = vld [vmem:[%s586_s0 + $0x20] sm:$0xff]  ;;  %v39_v43 = vpack.c.bf16 %v35_v42, %v31_v41  ;;  %377 = vmatprep.mubr.bf16.mxu1 %v40_v39 }
  0x1b   :  { %v38_v35 = vpack.c.bf16 %v34_v33, %v30_v32  ;;  %v37_v40 = vpack.c.bf16 %v33_v38, %v29_v37  ;;  %v393_v46 = vld [vmem:[%s588_s2] ss:$0 sm:$0xff] }
  0x1c   :  { %433 = vmatpush3.bf16.msra.mxu0 %v487_v14 }
  0x1d   :  { %455 = vmatpush3.bf16.msra.mxu1 %v488_v15  ;;  %434 = vmatprep.subr.bf16.mxu0 %v489_v16 }
  0x1e   :  { %456 = vmatprep.subr.bf16.mxu1 %v490_v17  ;;  %336 = vmatprep.mubr.bf16.mxu0 %v38_v35 }
  0x20   :  { %435 = vmatpush3.bf16.msra.mxu0 %v491_v18 }
  0x21   :  { %457 = vmatpush3.bf16.msra.mxu1 %v492_v19  ;;  %436 = vmatprep.subr.bf16.mxu0 %v493_v20 }
  0x22   :  { %458 = vmatprep.subr.bf16.mxu1 %v494_v21 }
  0x24   :  { %437 = vmatpush3.bf16.msra.mxu0 %v495_v22 }
  0x25   :  { %459 = vmatpush3.bf16.msra.mxu1 %v496_v23  ;;  %438 = vmatprep.subr.bf16.mxu0 %v497_v24 }
  0x26   :  { %460 = vmatprep.subr.bf16.mxu1 %v498_v25 }
  0x28   :  { %439 = vmatpush3.bf16.msra.mxu0 %v499_v26 }
  0x29   :  { %461 = vmatpush3.bf16.msra.mxu1 %v500_v27  ;;  %440 = vmatprep.subr.bf16.mxu0 %v501_v28 }
  0x2a   :  { %462 = vmatprep.subr.bf16.mxu1 %v502_v29 }
  0x2c   :  { %441 = vmatpush3.bf16.msra.mxu0 %v503_v30 }
  0x2d   :  { %463 = vmatpush3.bf16.msra.mxu1 %v504_v31 }
  0x2f   :  { %337 = vmatmul.mubr.bf16.vlgmr.msra.gmra.mxu0 %v37_v40 }
  0x30   :  { %378 = vmatmul.mubr.bf16.vlgmr.msra.gmra.mxu1 %v39_v43 }
  0xef   :  { %v442_v44 = vpop.f32.mrf.mxu0 }
  0xf0   :  { %v464_v45 = vpop.f32.mrf.mxu1 }
  0xf1   :  { %v443_v47 = vpop.f32.mrf.mxu0 }
  0xf2   :  { %v444_v48 = vadd.f32 %v443_v47, %v442_v44  ;;  %v465_v49 = vpop.f32.mrf.mxu1 }
  0xf3   :  { %v445_v50 = vpop.f32.mrf.mxu0  ;;  %v466_v52 = vadd.f32 %v465_v49, %v464_v45 }
  0xf4   :  { %v339_v51 = vadd.f32 %v444_v48, %v393_v46  ;;  %v467_v53 = vpop.f32.mrf.mxu1 }
  0xf5   :  { %v446_v54 = vpop.f32.mrf.mxu0 }
  0xf6   :  { %v380_v55 = vadd.f32 %v466_v52, %v339_v51  ;;  %v447_v56 = vadd.f32 %v446_v54, %v445_v50  ;;  %v468_v57 = vpop.f32.mrf.mxu1 }
  0xf7   :  { %v469_v59 = vadd.f32 %v468_v57, %v467_v53 }
  0xf8   :  { %386 = vst [vmem:[%s589_s3] sm:$0xff] %v380_v55  ;;  %v342_v58 = vadd.f32 %v447_v56, %v393_v46 }
  0xfa   :  { %v383_v60 = vadd.f32 %v469_v59, %v342_v58 }
  0xfc   :  { %387 = vst [vmem:[%s589_s3 + $0x8] sm:$0xff] %v383_v60 }
  0xfd   :  { %392 = vsyncpa [#allocation3], 1 }

</bundles_post_ra>
